<compile_context>
chip_gen: v7x
topology: tpu7x:2x2x1
jax: 0.10.0
libtpu: 0.0.40
codegen_flags: <defaults>
</compile_context>

<pallas_src>
import math
import functools

import jax
import jax.numpy as jnp
from jax import lax
from jax.experimental import pallas as pl
from jax.experimental.pallas import tpu as pltpu


# ----------------------------- Pallas kernel -----------------------------------
def _feats_embed_kernel(x_ref, w_ref, p_ref, o_ref, *, t_len, bias_rows):
    """One grid step = one M-tile of the flattened (B*T, C) input.

    x_ref : (M_TILE, C)          bf16 features, rows are (batch, region) pairs, region-major
    w_ref : (C, D)               bf16 fc weight (already transposed: x @ W)
    p_ref : (bias_rows + 8, D)   f32 packed params: rows [0:T) = fused bias (pos@W + b),
                                 padded to bias_rows (multiple of 8); row bias_rows = LN gamma,
                                 row bias_rows+1 = LN beta
    o_ref : (M_TILE, D)          bf16 output (lane-dense: D is a multiple of 128)
    """
    m_tile = x_ref.shape[0]
    d = o_ref.shape[1]
    reps = m_tile // t_len  # static: whole number of (batch) groups per tile

    # Packed invariants (single resident VMEM buffer, static slices -> zero-cost views).
    bias = p_ref[pl.ds(0, t_len), :]           # (T, D) fused positional bias
    gb = p_ref[pl.ds(bias_rows, 8), :]         # (8, D) sublane-aligned tail: gamma / beta
    gamma = gb[0:1, :]
    beta = gb[1:2, :]

    # fc on the MXU: bf16 x bf16 -> f32 accumulate.
    h = jnp.dot(x_ref[...], w_ref[...], preferred_element_type=jnp.float32)

    # Fused bias, broadcast over the batch groups in this tile via a layout-free
    # reshape (each (T, D) group is a whole number of (8,128) f32 vreg tiles).
    if reps == 1:
        h = h + bias
    else:
        h = (h.reshape(reps, t_len, d) + bias[None]).reshape(m_tile, d)
    h = jnp.maximum(h, 0.0)

    # Final LayerNorm over the embed dim (eps = 1e-5, biased variance = PyTorch default).
    mean = jnp.mean(h, axis=-1, keepdims=True)
    var = jnp.mean(jnp.square(h - mean), axis=-1, keepdims=True)
    h = (h - mean) * lax.rsqrt(var + 1e-5)
    o_ref[...] = (h * gamma + beta).astype(o_ref.dtype)


# ----------------------------- wrapper ------------------------------------------
def feats_transform_embed(x_raw, pos_emb, w, b, gamma, beta,
                          compute_dtype=jnp.bfloat16, out_dtype=jnp.bfloat16,
                          target_rows=8192):
    """x_raw: (B, C, T) f32 exactly as the PyTorch module receives it (feats_shape=(32,16)).

    Returns (B, T, D) in `out_dtype` (bf16 by default to halve HBM writeback; the kernel
    math — matmul accumulate, bias, relu, LayerNorm — is f32 regardless).
    """
    B, C, T = x_raw.shape
    D = w.shape[1]
    M = B * T

    # Module glue (feats_dim == 2, do_transpose): permute(0,2,1) -> (B, T, C); fused here
    # with the flatten to (B*T, C) and the bf16 cast into one XLA copy.
    x_flat = jnp.transpose(x_raw, (0, 2, 1)).reshape(M, C).astype(compute_dtype)
    w_c = w.astype(compute_dtype)

    # Defensive param shaping: accept (D,) or (1, D).
    b2 = jnp.asarray(b, jnp.float32).reshape(1, D)
    gamma2 = jnp.asarray(gamma, jnp.float32).reshape(1, D)
    beta2 = jnp.asarray(beta, jnp.float32).reshape(1, D)

    # Fused bias: (x + pos) @ W + b == x @ W + (pos @ W + b). Constant part in f32,
    # padded to a multiple of 8 rows so gamma/beta land on a sublane-aligned offset.
    fused_bias = pos_emb @ w + b2                                  # (T, D) f32
    bias_rows = pl.cdiv(T, 8) * 8
    params = jnp.concatenate(
        [fused_bias,
         jnp.zeros((bias_rows - T, D), jnp.float32),
         gamma2, beta2,
         jnp.zeros((6, D), jnp.float32)], axis=0)                  # (bias_rows + 8, D)

    # ---- M-tiling -------------------------------------------------------------
    # Row unit = lcm(T, 16): tiles stay a whole number of batch groups (for the bias
    # reshape-add) AND a multiple of the bf16 sublane tile (16).  Target ~8192 rows per
    # tile: large DMAs for the HBM-bound regime, ~5-6 MiB of double-buffered VMEM — safe
    # against v7x's 64 MiB as well as v5e/v6e's 128 MiB.
    unit = (T * 16) // math.gcd(T, 16)
    groups = pl.cdiv(M, unit)
    groups_per_tile = min(groups, max(1, target_rows // unit))
    grid_m = pl.cdiv(groups, groups_per_tile)
    if grid_m > 1 and grid_m % 2 == 1:
        # Even grid so both v7x TensorCores get whole tiles under "parallel" sharding.
        groups_per_tile = pl.cdiv(groups, grid_m + 1)
        grid_m = pl.cdiv(groups, groups_per_tile)
    m_tile = groups_per_tile * unit
    M_pad = grid_m * m_tile

    if M_pad != M:
        x_flat = jnp.pad(x_flat, ((0, M_pad - M), (0, 0)))         # tail tile: zero rows

    kernel = functools.partial(_feats_embed_kernel, t_len=T, bias_rows=bias_rows)
    out_flat = pl.pallas_call(
        kernel,
        out_shape=jax.ShapeDtypeStruct((M_pad, D), out_dtype),
        grid_spec=pltpu.PrefetchScalarGridSpec(
            num_scalar_prefetch=0,
            grid=(grid_m,),
            in_specs=[
                pl.BlockSpec((m_tile, C), lambda i: (i, 0)),            # x tile
                pl.BlockSpec((C, D), lambda i: (0, 0)),                 # fc weight (resident)
                pl.BlockSpec((bias_rows + 8, D), lambda i: (0, 0)),     # packed bias/gamma/beta
            ],
            out_specs=pl.BlockSpec((m_tile, D), lambda i: (i, 0)),      # lane-dense (D % 128 == 0)
        ),
        compiler_params=pltpu.CompilerParams(
            dimension_semantics=(("parallel",) if grid_m > 1 else ("arbitrary",)),
        ),
    )(x_flat, w_c, params)

    if M_pad != M:
        out_flat = out_flat[:M]
    return out_flat.reshape(B, T, D)   # row-major reshape: free


# ----------------------------- parameters / references --------------------------
def sinusoidal_positional_embedding(num_positions, embedding_dim):
    """fairseq SinusoidalPositionalEmbedding rows for positions 1..num_positions
    (input is all-ones, padding_idx=0 -> positions are 1..T)."""
    half_dim = embedding_dim // 2
    scale = math.log(10000.0) / (half_dim - 1)
    freqs = jnp.exp(jnp.arange(half_dim, dtype=jnp.float32) * -scale)
    positions = jnp.arange(1, num_positions + 1, dtype=jnp.float32)
    angles = positions[:, None] * freqs[None, :]
    emb = jnp.concatenate([jnp.sin(angles), jnp.cos(angles)], axis=1)
    if embedding_dim % 2 == 1:
        emb = jnp.concatenate([emb, jnp.zeros((num_positions, 1), jnp.float32)], axis=1)
    return emb                                                     # (T, C)


def init_params(key, feats_channels, embed_dim):
    """PyTorch nn.Linear default init: U(-1/sqrt(C), 1/sqrt(C)); LN gamma=1, beta=0."""
    kw, kb = jax.random.split(key)
    bound = 1.0 / math.sqrt(feats_channels)
    w = jax.random.uniform(kw, (feats_channels, embed_dim), jnp.float32, -bound, bound)  # (C, D) = W^T
    b = jax.random.uniform(kb, (1, embed_dim), jnp.float32, -bound, bound)
    gamma = jnp.ones((1, embed_dim), jnp.float32)
    beta = jnp.zeros((1, embed_dim), jnp.float32)
    return w, b, gamma, beta


def reference_matched(x_raw, pos_emb, w, b, gamma, beta, compute_dtype=jnp.bfloat16):
    """Pure-JAX reference mirroring the kernel numerics (bf16 matmul, f32 acc, fused bias,
    f32 LayerNorm); output left in f32 (the kernel's final bf16 cast is the only delta)."""
    x = jnp.transpose(x_raw, (0, 2, 1))
    b2 = jnp.asarray(b, jnp.float32).reshape(1, -1)
    fused = pos_emb @ w + b2
    h = jnp.einsum("btc,cd->btd", x.astype(compute_dtype), w.astype(compute_dtype),
                   preferred_element_type=jnp.float32) + fused[None]
    h = jnp.maximum(h, 0.0)
    mean = h.mean(-1, keepdims=True)
    var = jnp.square(h - mean).mean(-1, keepdims=True)
    return (h - mean) * lax.rsqrt(var + 1e-5) * gamma + beta


def reference_f32(x_raw, pos_emb, w, b, gamma, beta):
    """Pure-f32 reference with the original module's op order (dropout = identity)."""
    x = jnp.transpose(x_raw, (0, 2, 1)) + pos_emb[None]
    b2 = jnp.asarray(b, jnp.float32).reshape(1, -1)
    h = jnp.maximum(x @ w + b2, 0.0)
    mean = h.mean(-1, keepdims=True)
    var = jnp.square(h - mean).mean(-1, keepdims=True)
    return (h - mean) * lax.rsqrt(var + 1e-5) * gamma + beta


# ----------------------------- main ---------------------------------------------
if __name__ == "__main__":
    B = 2
    FEATS_SHAPE = (32, 16)            # x arrives as (B, 32, 16)
    FEATS_CHANNELS = FEATS_SHAPE[0]   # after the module's transpose: channels C = 32
    MAX_REGIONS = FEATS_SHAPE[1]      # regions T = 16
    EMBED_DIM = 128                   # encoder_embed_dim (small but lane-dense: multiple of 128)

    key = jax.random.PRNGKey(0)
    kx, kp = jax.random.split(key)
    x_raw = jax.random.normal(kx, (B,) + FEATS_SHAPE, dtype=jnp.float32)   # (2, 32, 16)

    pos_emb = sinusoidal_positional_embedding(MAX_REGIONS, FEATS_CHANNELS)  # (T, C)
    w, b, gamma, beta = init_params(kp, FEATS_CHANNELS, EMBED_DIM)

    fwd = jax.jit(feats_transform_embed)
    out = jax.block_until_ready(fwd(x_raw, pos_emb, w, b, gamma, beta))

    ref = reference_matched(x_raw, pos_emb, w, b, gamma, beta)
    ref32 = reference_f32(x_raw, pos_emb, w, b, gamma, beta)

    assert out.shape == (B, MAX_REGIONS, EMBED_DIM)
    assert out.dtype == jnp.bfloat16
    out_f32 = out.astype(jnp.float32)
    # bf16 output store: ~3 decimal digits vs the matched (f32-math) reference.
    assert jnp.allclose(out_f32, ref, atol=3e-2, rtol=3e-2), "mismatch vs matched JAX reference"
    assert jnp.allclose(out_f32, ref32, atol=1e-1), "mismatch vs f32 module reference"

    print("KERNEL_OK")
</pallas_src>

<mosaic_0001>
module attributes {stable_mosaic.version = 11 : i64} {
  func.func @_feats_embed_kernel(%arg0: i32, %arg1: memref<32x32xbf16, #tpu.memory_space<vmem>>, %arg2: memref<32x128xbf16, #tpu.memory_space<vmem>>, %arg3: memref<24x128xf32, #tpu.memory_space<vmem>>, %arg4: memref<32x128xbf16, #tpu.memory_space<vmem>>) attributes {dimension_semantics = [#tpu.dimension_semantics<arbitrary>], iteration_bounds = array<i64: 1>, scalar_prefetch = 0 : i64, scratch_operands = 0 : i64, tpu.core_type = #tpu.core_type<tc>, window_params = [{transform_indices = @transform_0, window_bounds = array<i64: 32, 32>}, {pipeline_mode = #tpu.pipeline_mode<synchronous>, transform_indices = @transform_1, window_bounds = array<i64: 32, 128>}, {pipeline_mode = #tpu.pipeline_mode<synchronous>, transform_indices = @transform_2, window_bounds = array<i64: 24, 128>}, {transform_indices = @transform_3, window_bounds = array<i64: 32, 128>}]} {
    %c0 = arith.constant 0 : index
    %c0_0 = arith.constant 0 : index
    %0 = vector.load %arg3[%c0, %c0_0] : memref<24x128xf32, #tpu.memory_space<vmem>>, vector<16x128xf32>
    %c16 = arith.constant 16 : index
    %c0_1 = arith.constant 0 : index
    %1 = vector.load %arg3[%c16, %c0_1] : memref<24x128xf32, #tpu.memory_space<vmem>>, vector<8x128xf32>
    %2 = vector.extract_strided_slice %1 {offsets = [0, 0], sizes = [1, 128], strides = [1, 1]} : vector<8x128xf32> to vector<1x128xf32>
    %3 = vector.extract_strided_slice %1 {offsets = [1, 0], sizes = [1, 128], strides = [1, 1]} : vector<8x128xf32> to vector<1x128xf32>
    %c0_2 = arith.constant 0 : index
    %c0_3 = arith.constant 0 : index
    %4 = vector.load %arg1[%c0_2, %c0_3] : memref<32x32xbf16, #tpu.memory_space<vmem>>, vector<32x32xbf16>
    %c0_4 = arith.constant 0 : index
    %c0_5 = arith.constant 0 : index
    %5 = vector.load %arg2[%c0_4, %c0_5] : memref<32x128xbf16, #tpu.memory_space<vmem>>, vector<32x128xbf16>
    %cst = arith.constant dense<0.000000e+00> : vector<32x128xf32>
    %6 = tpu.matmul %4, %5, %cst {dimension_numbers = #tpu.dot_dimension_numbers<[1], [0], [0], [1], [0, 0, 1, 1], [], []>} : vector<32x32xbf16>, vector<32x128xbf16>, vector<32x128xf32> -> vector<32x128xf32>
    %7 = vector.shape_cast %6 : vector<32x128xf32> to vector<2x16x128xf32>
    %8 = vector.shape_cast %0 : vector<16x128xf32> to vector<1x16x128xf32>
    %9 = vector.broadcast %8 : vector<1x16x128xf32> to vector<2x16x128xf32>
    %10 = arith.addf %7, %9 : vector<2x16x128xf32>
    %11 = vector.shape_cast %10 : vector<2x16x128xf32> to vector<32x128xf32>
    %cst_6 = arith.constant 0.000000e+00 : f32
    %12 = vector.broadcast %cst_6 : f32 to vector<32x128xf32>
    %13 = arith.maximumf %11, %12 : vector<32x128xf32>
    %cst_7 = arith.constant dense<0.000000e+00> : vector<32xf32>
    %14 = vector.multi_reduction <add>, %13, %cst_7 [1] : vector<32x128xf32> to vector<32xf32>
    %15 = vector.shape_cast %14 : vector<32xf32> to vector<32x1xf32>
    %cst_8 = arith.constant 1.280000e+02 : f32
    %16 = vector.broadcast %cst_8 : f32 to vector<32x1xf32>
    %17 = arith.divf %15, %16 : vector<32x1xf32>
    %18 = vector.broadcast %17 : vector<32x1xf32> to vector<32x128xf32>
    %19 = arith.subf %13, %18 : vector<32x128xf32>
    %20 = arith.mulf %19, %19 : vector<32x128xf32>
    %cst_9 = arith.constant dense<0.000000e+00> : vector<32xf32>
    %21 = vector.multi_reduction <add>, %20, %cst_9 [1] : vector<32x128xf32> to vector<32xf32>
    %22 = vector.shape_cast %21 : vector<32xf32> to vector<32x1xf32>
    %cst_10 = arith.constant 1.280000e+02 : f32
    %23 = vector.broadcast %cst_10 : f32 to vector<32x1xf32>
    %24 = arith.divf %22, %23 : vector<32x1xf32>
    %25 = vector.broadcast %17 : vector<32x1xf32> to vector<32x128xf32>
    %26 = arith.subf %13, %25 : vector<32x128xf32>
    %cst_11 = arith.constant 9.99999974E-6 : f32
    %27 = vector.broadcast %cst_11 : f32 to vector<32x1xf32>
    %28 = arith.addf %24, %27 : vector<32x1xf32>
    %29 = math.rsqrt %28 : vector<32x1xf32>
    %30 = vector.broadcast %29 : vector<32x1xf32> to vector<32x128xf32>
    %31 = arith.mulf %26, %30 : vector<32x128xf32>
    %32 = vector.broadcast %2 : vector<1x128xf32> to vector<32x128xf32>
    %33 = arith.mulf %31, %32 : vector<32x128xf32>
    %34 = vector.broadcast %3 : vector<1x128xf32> to vector<32x128xf32>
    %35 = arith.addf %33, %34 : vector<32x128xf32>
    %36 = arith.truncf %35 : vector<32x128xf32> to vector<32x128xbf16>
    %c0_12 = arith.constant 0 : index
    %c0_13 = arith.constant 0 : index
    %37 = vector.load %arg4[%c0_12, %c0_13] : memref<32x128xbf16, #tpu.memory_space<vmem>>, vector<32x128xbf16>
    tpu.vector_store %arg4[%c0_12, %c0_13], %36 {strides = array<i32>} : memref<32x128xbf16, #tpu.memory_space<vmem>>, vector<32x128xbf16>,
    return
  }
  func.func @transform_0(%arg0: i32) -> (i32, i32) {
    %c0_i32 = arith.constant 0 : i32
    %c0_i32_0 = arith.constant 0 : i32
    return %arg0, %c0_i32 : i32, i32
  }
  func.func @transform_1(%arg0: i32) -> (i32, i32) {
    %c0_i32 = arith.constant 0 : i32
    %c0_i32_0 = arith.constant 0 : i32
    %c0_i32_1 = arith.constant 0 : i32
    return %c0_i32, %c0_i32_0 : i32, i32
  }
  func.func @transform_2(%arg0: i32) -> (i32, i32) {
    %c0_i32 = arith.constant 0 : i32
    %c0_i32_0 = arith.constant 0 : i32
    %c0_i32_1 = arith.constant 0 : i32
    return %c0_i32, %c0_i32_0 : i32, i32
  }
  func.func @transform_3(%arg0: i32) -> (i32, i32) {
    %c0_i32 = arith.constant 0 : i32
    %c0_i32_0 = arith.constant 0 : i32
    return %arg0, %c0_i32 : i32, i32
  }
}

</mosaic_0001>

<bundles_post_ra>
// kernel: feats_transform_embed.1
= control target key start
LH: loop header
LB: loop body
LE: loop exit
PB: predicated region body
PF: predicated region fallthrough
CT: control target
= control target key end

     0   :  { %vm49_vm0 = vcmask 261120   ;;  %s342_s0 = inlined_call_operand.vmem [shape: bf16[32,32], index: 0, kind: input, shape index: {}]   ;;  %s343_s1 = inlined_call_operand.vmem [shape: bf16[32,128], index: 1, kind: input, shape index: {}]   ;;  %s344_s2 = inlined_call_operand.vmem [shape: f32[24,128], index: 2, kind: input, shape index: {}]   ;;  %s345_s3 = inlined_call_operand.hbm [shape: bf16[32,128], index: 3, kind: output, shape index: {}]  }
   0x1   :  { %v250_v0 = vld [vmem:[%s343_s1] sm:$0xff]   ;;  %v251_v1 = vld [vmem:[%s343_s1 + $0x8] sm:$0xff]  }
   0x2   :  { %239 = vmatprep.subr.bf16.mxu0 %v250_v0  ;;  %v252_v2 = vld [vmem:[%s342_s0] sm:$0xff]  }
   0x3   :  { %240 = vmatpush3.bf16.msra.mxu0 %v250_v0  ;;  %243 = vmatprep.mubr.msk.bf16.mxu0 %vm49_vm0, %v252_v2 }
   0x4   :  { %241 = vmatprep.subr.bf16.mxu0 %v251_v1 }
   0x5   :  { %8 = vsyncpa [#allocation3], 0  ;;  %v253_v3 = vld [vmem:[%s342_s0 + $0x8] sm:$0xff]   ;;  %v16_v4 = vld [vmem:[%s344_s2] sm:$0xff]  ;;  %v158_v39 = vlaneseq  ;;  %s286_s24 = smov [#allocation2]  }
   0x6   :  { %v17_v6 = vld [vmem:[%s344_s2 + $0x8] sm:$0xff]  ;;  %v18_v49 = vld [vmem:[%s344_s2 + $0x10] sm:$0xff]  ;;  %s199_s2 = sshll.u32 %s286_s24, 4  ;;  %s200_s2 = int_to_ptr.vmem [resolvable:$true] %s199_s2 }
   0x7   :  { %242 = vmatpush3.bf16.msra.mxu0 %v251_v1  ;;  %v159_v45 = vshrl.u32 %v158_v39, 7  ;;  %s262_s25 = scalar_lea.vmem %s200_s2, 256  ;;  %p267_p1 = scmp.lt.s32.totalorder %s200_s2, %s200_s2 }
   0x8   :  { %p263_p0 = scmp.ne.s32.totalorder %s200_s2, %s262_s25  ;;  %p268_p2 = scmp.lt.s32.totalorder %s262_s25, %s262_s25 }
   0x9   :  { %v160_v48 = vsub.s32 0, %v159_v45  ;;  %v168_v53 = vsub.s32 1, %v159_v45 }
   0xa   :  { %244 = vmatmul.mubr.msk.bf16.vlgmr.msra.gmra.mrb[0].mxu0 %vm49_vm0, %v253_v3  ;;  %p269_p3 = por %p268_p2, %p267_p1 }
   0xb   :  { %v161_v52 = vrot.slane %v18_v49, %v160_v48  ;;  %v169_v58 = vrot.slane %v18_v49, %v168_v53 }
   0xc   :  { %p270_p4 = pnand %p269_p3, %p263_p0 }
  0xdd   :  { %v245_v5 = vpop.f32.mrb[0].mxu0 }
  0xde   :  { %v107_v7 = vadd.f32 %v245_v5, %v16_v4  ;;  %v90_v8 = vpop.f32.mrb[1].mxu0 }
  0xdf   :  { %v105_v9 = vadd.f32 %v90_v8, %v16_v4  ;;  %v246_v10 = vpop.f32.mrb[2].mxu0 }
  0xe0   :  { %v111_v11 = vmax.f32 %v107_v7, 0.0  ;;  %v108_v12 = vadd.f32 %v246_v10, %v17_v6  ;;  %v93_v13 = vpop.f32.mrb[3].mxu0 }
  0xe1   :  { %v109_v14 = vmax.f32 %v105_v9, 0.0  ;;  %v106_v15 = vadd.f32 %v93_v13, %v17_v6 }
  0xe2   :  { %117 = vadd.xlane.f32.xlu1 %v111_v11  ;;  %v112_v16 = vmax.f32 %v108_v12, 0.0 }
  0xe3   :  { %113 = vadd.xlane.f32.xlu0 %v109_v14  ;;  %v110_v17 = vmax.f32 %v106_v15, 0.0 }
  0xe6   :  { %119 = vadd.xlane.f32.xlu1 %v112_v16 }
  0xe7   :  { %115 = vadd.xlane.f32.xlu0 %v110_v17 }
 0x16f   :  { %v118_v18 = vpop.xlane.xlu1 %117 }
 0x170   :  { %v114_v19 = vpop.xlane.xlu0 %113  ;;  %v124_v20 = vmul.f32 0.0078125, %v118_v18 }
 0x171   :  { %v122_v21 = vmul.f32 0.0078125, %v114_v19 }
 0x172   :  { %v128_v25 = vsub.f32 %v111_v11, %v124_v20 }
 0x173   :  { %v126_v22 = vsub.f32 %v109_v14, %v122_v21  ;;  %v120_v23 = vpop.xlane.xlu1 %119 }
 0x174   :  { %v116_v24 = vpop.xlane.xlu0 %115  ;;  %v125_v26 = vmul.f32 0.0078125, %v120_v23  ;;  %v132_v31 = vmul.f32 %v128_v25, %v128_v25 }
 0x175   :  { %v123_v27 = vmul.f32 0.0078125, %v116_v24  ;;  %v130_v28 = vmul.f32 %v126_v22, %v126_v22 }
 0x176   :  { %v129_v30 = vsub.f32 %v112_v16, %v125_v26 }
 0x177   :  { %v127_v29 = vsub.f32 %v110_v17, %v123_v27  ;;  %134 = vadd.xlane.f32.xlu0 %v130_v28 }
 0x178   :  { %v133_v33 = vmul.f32 %v129_v30, %v129_v30 }
 0x179   :  { %v131_v32 = vmul.f32 %v127_v29, %v127_v29 }
 0x17b   :  { %138 = vadd.xlane.f32.xlu0 %v132_v31  ;;  %136 = vadd.xlane.f32.xlu1 %v131_v32 }
 0x17f   :  { %140 = vadd.xlane.f32.xlu1 %v133_v33 }
 0x204   :  { %v135_v34 = vpop.xlane.xlu0 %134 }
 0x205   :  { %v142_v35 = vmul.f32 0.0078125, %v135_v34 }
 0x207   :  { %v146_v36 = vadd.f32 1e-05, %v142_v35 }
 0x208   :  { %v137_v37 = vpop.xlane.xlu1 %136  ;;  %v139_v38 = vpop.xlane.xlu0 %138 }
 0x209   :  { %254 = vrsqrt.f32 %v146_v36  ;;  %v143_v40 = vmul.f32 0.0078125, %v137_v37  ;;  %v144_v41 = vmul.f32 0.0078125, %v139_v38 }
 0x20b   :  { %v147_v42 = vadd.f32 1e-05, %v143_v40  ;;  %v148_v43 = vadd.f32 1e-05, %v144_v41 }
 0x20c   :  { %v141_v44 = vpop.xlane.xlu1 %140 }
 0x20d   :  { %256 = vrsqrt.f32 %v147_v42  ;;  %v145_v46 = vmul.f32 0.0078125, %v141_v44 }
 0x20e   :  { %258 = vrsqrt.f32 %v148_v43 }
 0x20f   :  { %v149_v47 = vadd.f32 1e-05, %v145_v46 }
 0x211   :  { %260 = vrsqrt.f32 %v149_v47 }
 0x213   :  { %v255_v50 = vpop.eup %254 }
 0x214   :  { %v154_v51 = vmul.f32 %v255_v50, %v126_v22 }
 0x216   :  { %v162_v57 = vmul.f32 %v161_v52, %v154_v51 }
 0x217   :  { %v257_v54 = vpop.eup %256 }
 0x218   :  { %v259_v55 = vpop.eup %258  ;;  %v155_v56 = vmul.f32 %v257_v54, %v127_v29  ;;  %v170_v0 = vadd.f32 %v169_v58, %v162_v57 }
 0x219   :  { %v156_v59 = vmul.f32 %v259_v55, %v128_v25 }
 0x21a   :  { %v163_v60 = vmul.f32 %v161_v52, %v155_v56 }
 0x21b   :  { %v261_v61 = vpop.eup %260  ;;  %v164_v63 = vmul.f32 %v161_v52, %v156_v59 }
 0x21c   :  { %v157_v62 = vmul.f32 %v261_v61, %v129_v30  ;;  %v171_v1 = vadd.f32 %v169_v58, %v163_v60 }
 0x21d   :  { %v172_v4 = vadd.f32 %v169_v58, %v164_v63 }
 0x21e   :  { %v165_v2 = vmul.f32 %v161_v52, %v157_v62  ;;  %v227_v3 = vpack.c.bf16 %v171_v1, %v170_v0 }
 0x220   :  { %v173_v5 = vadd.f32 %v169_v58, %v165_v2  ;;  %228 = vst [vmem:[#allocation2] sm:$0xff] %v227_v3  }
 0x222   :  { %v232_v6 = vpack.c.bf16 %v173_v5, %v172_v4 }
 0x224   :  { %234 = vst [vmem:[#allocation2 + $0x8] sm:$0xff] %v232_v6  }
 0x225   :  { %273 = shalt.err (!%p270_p4)
}
 0x226   :  { %s274_s28 = scalar_lea.hbm %s345_s3, 256 }
 0x227   :  { %p275_p5 = scmp.ne.s32.totalorder %s345_s3, %s274_s28  ;;  %p278_p6 = scmp.lt.u32.totalorder %s274_s28, %s345_s3 }
 0x229   :  { %p280_p7 = pnand %p278_p6, %p275_p5 }
 0x22b   :  { %283 = shalt.err (!%p280_p7)
}
 0x22c   :  { %s287_s6 = smov 64   ;;  %s288_s7 = smov 4  }
 0x22d   :  { %205 = dma.vmem_to_hbm [thread:$0]  %s200_s2, 256, %s345_s3, [#allocation3], %s287_s6, %s287_s6, %s288_s7  }
 0x22e   :  { %284 = dma.done.wait [#allocation3], 256  }
 0x22f   :  { %285 = vsyncadd [#allocation3], 4294967040 }
 0x230   :  { %209 = vsyncpa [#allocation3], 1 }

</bundles_post_ra>
